<compile_context>
chip_gen: v7x
topology: tpu7x:2x2x1
jax: 0.10.0
libtpu: 0.0.40
codegen_flags: <defaults>
</compile_context>

<pallas_src>
import jax
import jax.numpy as jnp
from jax.experimental import pallas as pl
from jax.experimental.pallas import tpu as pltpu

EPS = 1e-5
MAX_TILE_B = 8192  # 8192 rows x 128 padded lanes x 2B (bf16) x 2 bufs ~= 4 MiB; safe on v5e/v6e/v7x


def mlp_kernel(x_ref, w1_ref, b1_ref, w2_ref, b2_ref, w3_ref, b3_ref,
               w4d_ref, b4d_ref, out_ref):
    # x_ref: (TILE_B, 27) bf16.  BatchNorm already folded into w1/b1.
    h = jnp.dot(x_ref[...], w1_ref[...],
                preferred_element_type=jnp.float32) + b1_ref[...]
    h = jnp.maximum(h, 0.0).astype(jnp.bfloat16)

    h = jnp.dot(h, w2_ref[...],
                preferred_element_type=jnp.float32) + b2_ref[...]
    h = jnp.maximum(h, 0.0).astype(jnp.bfloat16)

    h = jnp.dot(h, w3_ref[...],
                preferred_element_type=jnp.float32) + b3_ref[...]
    h = jnp.maximum(h, 0.0).astype(jnp.bfloat16)

    # 2-class softmax via sigmoid of the logit difference (no lane reduce).
    d = jnp.dot(h, w4d_ref[...],
                preferred_element_type=jnp.float32) + b4d_ref[...]   # (TILE_B, 1)
    p1 = pl.reciprocal(1.0 + jnp.exp(-d), approx=True)               # sigmoid, EUP path

    col = jax.lax.broadcasted_iota(jnp.int32, out_ref.shape, 1)      # (TILE_B, 2)
    out_ref[...] = jnp.where(col == 1, p1, 1.0 - p1).astype(out_ref.dtype)


def _round_up(n, m):
    return ((n + m - 1) // m) * m


@jax.jit
def neural_network_forward(x, params):
    """x: (B, 27) float32.  params: dict of arrays (see init_params)."""
    B, F = x.shape
    x32 = x.astype(jnp.float32)

    # ---- BatchNorm1d(27): full-batch training-mode stats, folded into Linear 1 ----
    mean = jnp.mean(x32, axis=0, keepdims=True)                      # (1, 27)
    var = jnp.mean((x32 - mean) ** 2, axis=0, keepdims=True)         # (1, 27), biased
    scale = params["bn_gamma"] * jax.lax.rsqrt(var + EPS)            # (1, 27)
    shift = params["bn_beta"] - mean * scale                         # (1, 27)
    w1f = scale.reshape(F, 1) * params["w1"]                         # (27, 64)
    b1f = shift @ params["w1"] + params["b1"]                        # (1, 64)

    # ---- fold the 2-class softmax into a single logit difference ----
    w4d = params["w4"][:, 1:2] - params["w4"][:, 0:1]                # (32, 1)
    b4d = params["b4"][:, 1:2] - params["b4"][:, 0:1]                # (1, 1)

    # ---- bf16 matmul operands (accumulation stays f32) ----
    x_bf = x32.astype(jnp.bfloat16)
    w1b = w1f.astype(jnp.bfloat16)
    w2b = params["w2"].astype(jnp.bfloat16)
    w3b = params["w3"].astype(jnp.bfloat16)
    w4b = w4d.astype(jnp.bfloat16)

    # ---- batch tiling / padding ----
    tile_b = min(MAX_TILE_B, _round_up(B, 8))
    b_pad = _round_up(B, tile_b)
    if b_pad != B:
        x_bf = jnp.pad(x_bf, ((0, b_pad - B), (0, 0)))

    args = (x_bf, w1b, b1f, w2b, params["b2"], w3b, params["b3"], w4b, b4d)

    def const_spec(arr):
        # Full-array block, invariant index map -> stays VMEM-resident across steps.
        return pl.BlockSpec(arr.shape, lambda i: (0, 0))

    in_specs = [pl.BlockSpec((tile_b, F), lambda i: (i, 0))] + \
               [const_spec(a) for a in args[1:]]

    out = pl.pallas_call(
        mlp_kernel,
        out_shape=jax.ShapeDtypeStruct((b_pad, 2), jnp.float32),
        grid=(b_pad // tile_b,),
        in_specs=in_specs,
        out_specs=pl.BlockSpec((tile_b, 2), lambda i: (i, 0)),
        compiler_params=pltpu.CompilerParams(
            dimension_semantics=("parallel",)),
    )(*args)
    return out[:B]


def init_params(key):
    """Deterministic init mimicking PyTorch defaults:
       Linear: U(-1/sqrt(fan_in), 1/sqrt(fan_in)) for weight & bias (weight
       stored transposed as (in, out));  BatchNorm1d: gamma=1, beta=0."""
    dims = [(27, 64), (64, 32), (32, 32), (32, 2)]
    params = {
        "bn_gamma": jnp.ones((1, 27), jnp.float32),
        "bn_beta": jnp.zeros((1, 27), jnp.float32),
    }
    keys = jax.random.split(key, 2 * len(dims))
    for i, (fan_in, fan_out) in enumerate(dims):
        bound = 1.0 / (fan_in ** 0.5)
        w = jax.random.uniform(keys[2 * i], (fan_in, fan_out),
                               jnp.float32, -bound, bound)
        b = jax.random.uniform(keys[2 * i + 1], (1, fan_out),
                               jnp.float32, -bound, bound)
        params[f"w{i + 1}"] = w
        params[f"b{i + 1}"] = b
    return params


def reference_forward(x, params):
    """Pure-JAX f32 reference (exact BN + full softmax)."""
    mean = jnp.mean(x, axis=0, keepdims=True)
    var = jnp.mean((x - mean) ** 2, axis=0, keepdims=True)
    h = (x - mean) / jnp.sqrt(var + EPS) * params["bn_gamma"] + params["bn_beta"]
    h = jnp.maximum(h @ params["w1"] + params["b1"], 0.0)
    h = jnp.maximum(h @ params["w2"] + params["b2"], 0.0)
    h = jnp.maximum(h @ params["w3"] + params["b3"], 0.0)
    logits = h @ params["w4"] + params["b4"]
    return jax.nn.softmax(logits, axis=1)


if __name__ == "__main__":
    key = jax.random.PRNGKey(0)
    k_x, k_p = jax.random.split(key)

    B = 8
    x = jax.random.normal(k_x, (B, 27), jnp.float32)
    params = init_params(k_p)

    out = neural_network_forward(x, params)
    out = jax.block_until_ready(out)

    ref = reference_forward(x, params)
    assert out.shape == (B, 2)
    # bf16 matmul operands + approx reciprocal -> loosened tolerance vs f32 reference.
    assert jnp.allclose(out, ref, atol=3e-2, rtol=3e-2), "mismatch vs JAX reference"
    assert jnp.allclose(jnp.sum(out, axis=1), 1.0, atol=1e-5), "softmax rows must sum to 1"

    print("KERNEL_OK")
</pallas_src>

<mosaic_0001>
module attributes {stable_mosaic.version = 11 : i64} {
  func.func @mlp_kernel(%arg0: i32, %arg1: memref<8x27xbf16, #tpu.memory_space<vmem>>, %arg2: memref<27x64xbf16, #tpu.memory_space<vmem>>, %arg3: memref<1x64xf32, #tpu.memory_space<vmem>>, %arg4: memref<64x32xbf16, #tpu.memory_space<vmem>>, %arg5: memref<1x32xf32, #tpu.memory_space<vmem>>, %arg6: memref<32x32xbf16, #tpu.memory_space<vmem>>, %arg7: memref<1x32xf32, #tpu.memory_space<vmem>>, %arg8: memref<32x1xbf16, #tpu.memory_space<vmem>>, %arg9: memref<1x1xf32, #tpu.memory_space<vmem>>, %arg10: memref<8x2xf32, #tpu.memory_space<vmem>>) attributes {dimension_semantics = [#tpu.dimension_semantics<parallel>], iteration_bounds = array<i64: 1>, scalar_prefetch = 0 : i64, scratch_operands = 0 : i64, tpu.core_type = #tpu.core_type<tc>, window_params = [{transform_indices = @transform_0, window_bounds = array<i64: 8, 27>}, {pipeline_mode = #tpu.pipeline_mode<synchronous>, transform_indices = @transform_1, window_bounds = array<i64: 27, 64>}, {pipeline_mode = #tpu.pipeline_mode<synchronous>, transform_indices = @transform_2, window_bounds = array<i64: 1, 64>}, {pipeline_mode = #tpu.pipeline_mode<synchronous>, transform_indices = @transform_3, window_bounds = array<i64: 64, 32>}, {pipeline_mode = #tpu.pipeline_mode<synchronous>, transform_indices = @transform_4, window_bounds = array<i64: 1, 32>}, {pipeline_mode = #tpu.pipeline_mode<synchronous>, transform_indices = @transform_5, window_bounds = array<i64: 32, 32>}, {pipeline_mode = #tpu.pipeline_mode<synchronous>, transform_indices = @transform_6, window_bounds = array<i64: 1, 32>}, {pipeline_mode = #tpu.pipeline_mode<synchronous>, transform_indices = @transform_7, window_bounds = array<i64: 32, 1>}, {pipeline_mode = #tpu.pipeline_mode<synchronous>, transform_indices = @transform_8, window_bounds = array<i64: 1, 1>}, {transform_indices = @transform_9, window_bounds = array<i64: 8, 2>}]} {
    %c0 = arith.constant 0 : index
    %c0_0 = arith.constant 0 : index
    %0 = vector.load %arg1[%c0, %c0_0] : memref<8x27xbf16, #tpu.memory_space<vmem>>, vector<8x27xbf16>
    %c0_1 = arith.constant 0 : index
    %c0_2 = arith.constant 0 : index
    %1 = vector.load %arg2[%c0_1, %c0_2] : memref<27x64xbf16, #tpu.memory_space<vmem>>, vector<27x64xbf16>
    %cst = arith.constant dense<0.000000e+00> : vector<8x64xf32>
    %2 = tpu.matmul %0, %1, %cst {dimension_numbers = #tpu.dot_dimension_numbers<[1], [0], [0], [1], [0, 0, 1, 1], [], []>} : vector<8x27xbf16>, vector<27x64xbf16>, vector<8x64xf32> -> vector<8x64xf32>
    %c0_3 = arith.constant 0 : index
    %c0_4 = arith.constant 0 : index
    %3 = vector.load %arg3[%c0_3, %c0_4] : memref<1x64xf32, #tpu.memory_space<vmem>>, vector<1x64xf32>
    %4 = vector.broadcast %3 : vector<1x64xf32> to vector<8x64xf32>
    %5 = arith.addf %2, %4 : vector<8x64xf32>
    %cst_5 = arith.constant 0.000000e+00 : f32
    %6 = vector.broadcast %cst_5 : f32 to vector<8x64xf32>
    %7 = arith.maximumf %5, %6 : vector<8x64xf32>
    %8 = arith.truncf %7 : vector<8x64xf32> to vector<8x64xbf16>
    %c0_6 = arith.constant 0 : index
    %c0_7 = arith.constant 0 : index
    %9 = vector.load %arg4[%c0_6, %c0_7] : memref<64x32xbf16, #tpu.memory_space<vmem>>, vector<64x32xbf16>
    %cst_8 = arith.constant dense<0.000000e+00> : vector<8x32xf32>
    %10 = tpu.matmul %8, %9, %cst_8 {dimension_numbers = #tpu.dot_dimension_numbers<[1], [0], [0], [1], [0, 0, 1, 1], [], []>} : vector<8x64xbf16>, vector<64x32xbf16>, vector<8x32xf32> -> vector<8x32xf32>
    %c0_9 = arith.constant 0 : index
    %c0_10 = arith.constant 0 : index
    %11 = vector.load %arg5[%c0_9, %c0_10] : memref<1x32xf32, #tpu.memory_space<vmem>>, vector<1x32xf32>
    %12 = vector.broadcast %11 : vector<1x32xf32> to vector<8x32xf32>
    %13 = arith.addf %10, %12 : vector<8x32xf32>
    %cst_11 = arith.constant 0.000000e+00 : f32
    %14 = vector.broadcast %cst_11 : f32 to vector<8x32xf32>
    %15 = arith.maximumf %13, %14 : vector<8x32xf32>
    %16 = arith.truncf %15 : vector<8x32xf32> to vector<8x32xbf16>
    %c0_12 = arith.constant 0 : index
    %c0_13 = arith.constant 0 : index
    %17 = vector.load %arg6[%c0_12, %c0_13] : memref<32x32xbf16, #tpu.memory_space<vmem>>, vector<32x32xbf16>
    %cst_14 = arith.constant dense<0.000000e+00> : vector<8x32xf32>
    %18 = tpu.matmul %16, %17, %cst_14 {dimension_numbers = #tpu.dot_dimension_numbers<[1], [0], [0], [1], [0, 0, 1, 1], [], []>} : vector<8x32xbf16>, vector<32x32xbf16>, vector<8x32xf32> -> vector<8x32xf32>
    %c0_15 = arith.constant 0 : index
    %c0_16 = arith.constant 0 : index
    %19 = vector.load %arg7[%c0_15, %c0_16] : memref<1x32xf32, #tpu.memory_space<vmem>>, vector<1x32xf32>
    %20 = vector.broadcast %19 : vector<1x32xf32> to vector<8x32xf32>
    %21 = arith.addf %18, %20 : vector<8x32xf32>
    %cst_17 = arith.constant 0.000000e+00 : f32
    %22 = vector.broadcast %cst_17 : f32 to vector<8x32xf32>
    %23 = arith.maximumf %21, %22 : vector<8x32xf32>
    %24 = arith.truncf %23 : vector<8x32xf32> to vector<8x32xbf16>
    %c0_18 = arith.constant 0 : index
    %c0_19 = arith.constant 0 : index
    %25 = vector.load %arg8[%c0_18, %c0_19] : memref<32x1xbf16, #tpu.memory_space<vmem>>, vector<32x1xbf16>
    %cst_20 = arith.constant dense<0.000000e+00> : vector<8x1xf32>
    %26 = tpu.matmul %24, %25, %cst_20 {dimension_numbers = #tpu.dot_dimension_numbers<[1], [0], [0], [1], [0, 0, 1, 1], [], []>} : vector<8x32xbf16>, vector<32x1xbf16>, vector<8x1xf32> -> vector<8x1xf32>
    %c0_21 = arith.constant 0 : index
    %c0_22 = arith.constant 0 : index
    %27 = vector.load %arg9[%c0_21, %c0_22] : memref<1x1xf32, #tpu.memory_space<vmem>>, vector<1x1xf32>
    %28 = vector.broadcast %27 : vector<1x1xf32> to vector<8x1xf32>
    %29 = arith.addf %26, %28 : vector<8x1xf32>
    %cst_23 = arith.constant 0.000000e+00 : f32
    %30 = vector.broadcast %cst_23 : f32 to vector<8x1xf32>
    %31 = arith.subf %30, %29 : vector<8x1xf32>
    %32 = math.exp %31 : vector<8x1xf32>
    %cst_24 = arith.constant 1.000000e+00 : f32
    %33 = vector.broadcast %cst_24 : f32 to vector<8x1xf32>
    %34 = arith.addf %33, %32 : vector<8x1xf32>
    %35 = tpu.reciprocal %34 {approx = true} : vector<8x1xf32> -> vector<8x1xf32>
    %36 = tpu.iota {dimensions = array<i32: 1>} : vector<8x2xi32>
    %c1_i32 = arith.constant 1 : i32
    %37 = vector.broadcast %c1_i32 : i32 to vector<8x2xi32>
    %38 = arith.cmpi eq, %36, %37 : vector<8x2xi32>
    %cst_25 = arith.constant 1.000000e+00 : f32
    %39 = vector.broadcast %cst_25 : f32 to vector<8x1xf32>
    %40 = arith.subf %39, %35 : vector<8x1xf32>
    %41 = vector.shape_cast %35 : vector<8x1xf32> to vector<8x1xf32>
    %42 = vector.broadcast %41 : vector<8x1xf32> to vector<8x2xf32>
    %43 = vector.shape_cast %40 : vector<8x1xf32> to vector<8x1xf32>
    %44 = vector.broadcast %43 : vector<8x1xf32> to vector<8x2xf32>
    %45 = arith.select %38, %42, %44 : vector<8x2xi1>, vector<8x2xf32>
    %c0_26 = arith.constant 0 : index
    %c0_27 = arith.constant 0 : index
    %46 = vector.load %arg10[%c0_26, %c0_27] : memref<8x2xf32, #tpu.memory_space<vmem>>, vector<8x2xf32>
    tpu.vector_store %arg10[%c0_26, %c0_27], %45 {strides = array<i32>} : memref<8x2xf32, #tpu.memory_space<vmem>>, vector<8x2xf32>,
    return
  }
  func.func @transform_0(%arg0: i32) -> (i32, i32) {
    %c0_i32 = arith.constant 0 : i32
    %c0_i32_0 = arith.constant 0 : i32
    return %arg0, %c0_i32 : i32, i32
  }
  func.func @transform_1(%arg0: i32) -> (i32, i32) {
    %c0_i32 = arith.constant 0 : i32
    %c0_i32_0 = arith.constant 0 : i32
    %c0_i32_1 = arith.constant 0 : i32
    return %c0_i32, %c0_i32_0 : i32, i32
  }
  func.func @transform_2(%arg0: i32) -> (i32, i32) {
    %c0_i32 = arith.constant 0 : i32
    %c0_i32_0 = arith.constant 0 : i32
    %c0_i32_1 = arith.constant 0 : i32
    return %c0_i32, %c0_i32_0 : i32, i32
  }
  func.func @transform_3(%arg0: i32) -> (i32, i32) {
    %c0_i32 = arith.constant 0 : i32
    %c0_i32_0 = arith.constant 0 : i32
    %c0_i32_1 = arith.constant 0 : i32
    return %c0_i32, %c0_i32_0 : i32, i32
  }
  func.func @transform_4(%arg0: i32) -> (i32, i32) {
    %c0_i32 = arith.constant 0 : i32
    %c0_i32_0 = arith.constant 0 : i32
    %c0_i32_1 = arith.constant 0 : i32
    return %c0_i32, %c0_i32_0 : i32, i32
  }
  func.func @transform_5(%arg0: i32) -> (i32, i32) {
    %c0_i32 = arith.constant 0 : i32
    %c0_i32_0 = arith.constant 0 : i32
    %c0_i32_1 = arith.constant 0 : i32
    return %c0_i32, %c0_i32_0 : i32, i32
  }
  func.func @transform_6(%arg0: i32) -> (i32, i32) {
    %c0_i32 = arith.constant 0 : i32
    %c0_i32_0 = arith.constant 0 : i32
    %c0_i32_1 = arith.constant 0 : i32
    return %c0_i32, %c0_i32_0 : i32, i32
  }
  func.func @transform_7(%arg0: i32) -> (i32, i32) {
    %c0_i32 = arith.constant 0 : i32
    %c0_i32_0 = arith.constant 0 : i32
    %c0_i32_1 = arith.constant 0 : i32
    return %c0_i32, %c0_i32_0 : i32, i32
  }
  func.func @transform_8(%arg0: i32) -> (i32, i32) {
    %c0_i32 = arith.constant 0 : i32
    %c0_i32_0 = arith.constant 0 : i32
    %c0_i32_1 = arith.constant 0 : i32
    return %c0_i32, %c0_i32_0 : i32, i32
  }
  func.func @transform_9(%arg0: i32) -> (i32, i32) {
    %c0_i32 = arith.constant 0 : i32
    %c0_i32_0 = arith.constant 0 : i32
    return %arg0, %c0_i32 : i32, i32
  }
}

</mosaic_0001>

<bundles_post_ra>
// kernel: neural_network_forward.1
= control target key start
LH: loop header
LB: loop body
LE: loop exit
PB: predicated region body
PF: predicated region fallthrough
CT: control target
= control target key end

     0   :  { %vm62_vm0 = vcmask 1044480   ;;  %vm63_vm1 = vcmask 1045504   ;;  %v444_v0 = vmov 0.0   ;;  %v445_v2 = vmov 65535   ;;  %s566_s1 = inlined_call_operand.vmem [shape: bf16[27,64], index: 1, kind: input, shape index: {}]   ;;  %s567_s3 = inlined_call_operand.vmem [shape: bf16[64,32], index: 3, kind: input, shape index: {}]   ;;  %s568_s0 = inlined_call_operand.vmem [shape: bf16[8,27], index: 0, kind: input, shape index: {}]   ;;  %s569_s5 = inlined_call_operand.vmem [shape: bf16[32,32], index: 5, kind: input, shape index: {}]   ;;  %s570_s2 = inlined_call_operand.vmem [shape: f32[1,64], index: 2, kind: input, shape index: {}]   ;;  %s571_s7 = inlined_call_operand.vmem [shape: bf16[32,1], index: 7, kind: input, shape index: {}]   ;;  %s572_s4 = inlined_call_operand.vmem [shape: f32[1,32], index: 4, kind: input, shape index: {}]   ;;  %s573_s8 = inlined_call_operand.<no memory space> [shape: f32[1,1], index: 8, kind: input, shape index: {}]   ;;  %s574_s6 = inlined_call_operand.vmem [shape: f32[1,32], index: 6, kind: input, shape index: {}]   ;;  %s575_s9 = inlined_call_operand.vmem [shape: f32[8,2], index: 9, kind: output, shape index: {}]  }
   0x1   :  { %389 = vmatprep.subr.bf16.mxu0 %v444_v0  ;;  %v430_v1 = vld [vmem:[%s566_s1] sm:$0xff]   ;;  %v64_v3 = vsel %vm62_vm0, 4294967295, %v445_v2  ;;  %397 = vmatprep.subr.bf16.mxu1 %v444_v0  ;;  %v431_v4 = vld [vmem:[%s566_s1 + $0x8] sm:$0x3f]   ;;  %vm446_vm2 = vmmov 0   ;;  %vm58_vm3 = vcmask 220160   ;;  %v14_v32 = vstv %s573_s8 }
   0x2   :  { %390 = vmatpush3.bf16.msra.mxu0 %v430_v1  ;;  %v65_v5 = vsel %vm63_vm1, %v64_v3, 0  ;;  %v432_v6 = vld [vmem:[%s567_s3] sm:$0xff]   ;;  %393 = vmatprep.mubr.msk.bf16.mxu0 %vm446_vm2, %v444_v0  ;;  %v433_v8 = vld [vmem:[%s567_s3 + $0x8] sm:$0xff]   ;;  %v434_v10 = vld [vmem:[%s567_s3 + $0x10] sm:$0xff]   ;;  %vm150_vm4 = vcmask 523264   ;;  %vm219_vm5 = vcmask 261120   ;;  %v336_v54 = vlaneseq }
   0x3   :  { %391 = vmatprep.subr.bf16.mxu0 %v444_v0  ;;  %v67_v7 = vand.u32 %v431_v4, %v65_v5  ;;  %398 = vmatpush3.bf16.msra.mxu1 %v432_v6  ;;  %v35_v9 = vld [vmem:[%s568_s0] sm:$0xf]  ;;  %v435_v11 = vld [vmem:[%s567_s3 + $0x18] sm:$0xff]   ;;  %v437_v21 = vld [vmem:[%s569_s5 + $0x8] sm:$0xff]   ;;  %15 = vst [vmem:[#allocation2] sm:$0x1] %v14_v32 }
   0x4   :  { %405 = vmatprep.mubr.msk.bf16.mxu1 %vm446_vm2, %v444_v0  ;;  %399 = vmatprep.subr.bf16.mxu1 %v444_v0  ;;  %v436_v12 = vld [vmem:[%s569_s5] sm:$0xff]   ;;  %v439_v31 = vld [vmem:[%s571_s7 + $0x8] sm:$0xff]   ;;  %v447_v41 = vmov 0   ;;  %v337_v55 = vand.u32 127, %v336_v54  ;;  %vm351_vm7 = vcmask 15360  }
   0x5   :  { %v357_v13 = vld [vmem:[%s570_s2] ss:$0 sm:$0xff]  ;;  %429 = vset.pattern.permute.xlu0 %v447_v41 }
   0x6   :  { %392 = vmatpush3.bf16.msra.mxu0 %v67_v7  ;;  %v361_v22 = vld [vmem:[%s572_s4] ss:$0 sm:$0xff]  ;;  %vm338_vm6 = vcmp.eq.s32.totalorder %v337_v55, 1 }
   0x7   :  { %409 = vmatprep.subr.bf16.mxu0 %v444_v0  ;;  %400 = vmatpush3.bf16.msra.mxu1 %v433_v8  ;;  %v438_v29 = vld [vmem:[%s571_s7] sm:$0xff]  }
   0x8   :  { %401 = vmatprep.subr.bf16.mxu1 %v444_v0  ;;  %v367_v33 = vld [vmem:[%s574_s6] ss:$0 sm:$0xff] }
   0x9   :  { %394 = vmatmul.mubr.msk.bf16.vlgmr.msra.gmra.mrb[0].mxu0 %vm58_vm3, %v35_v9 }
   0xa   :  { %413 = vmatprep.mubr.msk.bf16.mxu0 %vm446_vm2, %v444_v0  ;;  %410 = vmatpush3.bf16.msra.mxu0 %v436_v12  ;;  %v371_v42 = vld [vmem:[#allocation2] ss:$0 sm:$0xff] }
   0xb   :  { %402 = vmatpush3.bf16.msra.mxu1 %v434_v10  ;;  %411 = vmatprep.subr.bf16.mxu0 %v444_v0 }
   0xc   :  { %403 = vmatprep.subr.bf16.mxu1 %v444_v0 }
   0xe   :  { %412 = vmatpush3.bf16.msra.mxu0 %v437_v21 }
   0xf   :  { %404 = vmatpush3.bf16.msra.mxu1 %v435_v11  ;;  %417 = vmatprep.subr.bf16.mxu0 %v444_v0 }
  0xdc   :  { %v103_v14 = vpop.f32.mrb[0].mxu0 }
  0xdd   :  { %v104_v15 = vadd.f32 %v357_v13, %v103_v14  ;;  %v395_v16 = vpop.f32.mrb[1].mxu0 }
  0xde   :  { %v106_v17 = vpop.f32.mrb[2].mxu0 }
  0xdf   :  { %v109_v18 = vmax.f32 %v104_v15, 0.0  ;;  %v396_v19 = vpop.f32.mrb[3].mxu0 }
  0xe1   :  { %v110_v20 = vpack.c.bf16 %v109_v18, %v109_v18 }
  0xe3   :  { %406 = vmatmul.mubr.msk.bf16.vlgmr.msra.gmra.mrb[0].mxu1 %vm150_vm4, %v110_v20 }
 0x1b6   :  { %v188_v23 = vpop.f32.mrb[0].mxu1 }
 0x1b7   :  { %v189_v24 = vadd.f32 %v361_v22, %v188_v23  ;;  %v407_v25 = vpop.f32.mrb[1].mxu1 }
 0x1b8   :  { %v191_v26 = vpop.f32.mrb[2].mxu1 }
 0x1b9   :  { %v194_v27 = vmax.f32 %v189_v24, 0.0  ;;  %v408_v28 = vpop.f32.mrb[3].mxu1 }
 0x1bb   :  { %v195_v30 = vpack.c.bf16 %v194_v27, %v194_v27 }
 0x1bd   :  { %414 = vmatmul.mubr.msk.bf16.vlgmr.msra.gmra.mrb[4].mxu0 %vm219_vm5, %v195_v30 }
 0x1be   :  { %418 = vmatpush3.bf16.msra.mxu0 %v438_v29  ;;  %421 = vmatprep.mubr.msk.bf16.mxu0 %vm446_vm2, %v444_v0 }
 0x1bf   :  { %419 = vmatprep.subr.bf16.mxu0 %v444_v0 }
 0x1c2   :  { %420 = vmatpush3.bf16.msra.mxu0 %v439_v31 }
 0x290   :  { %v257_v34 = vpop.f32.mrb[4].mxu0 }
 0x291   :  { %v258_v35 = vadd.f32 %v367_v33, %v257_v34  ;;  %v415_v36 = vpop.f32.mrb[5].mxu0 }
 0x292   :  { %v260_v37 = vpop.f32.mrb[6].mxu0 }
 0x293   :  { %v263_v38 = vmax.f32 %v258_v35, 0.0  ;;  %v416_v39 = vpop.f32.mrb[7].mxu0 }
 0x295   :  { %v264_v40 = vpack.c.bf16 %v263_v38, %v263_v38 }
 0x297   :  { %422 = vmatmul.mubr.msk.bf16.vlgmr.msra.gmra.mrb[8].mxu0 %vm219_vm5, %v264_v40 }
 0x36a   :  { %v325_v43 = vpop.f32.mrb[8].mxu0 }
 0x36b   :  { %v326_v44 = vadd.f32 %v371_v42, %v325_v43  ;;  %v423_v45 = vpop.f32.mrb[9].mxu0 }
 0x36c   :  { %v328_v46 = vpop.f32.mrb[10].mxu0 }
 0x36d   :  { %v331_v47 = vsub.f32 0.0, %v326_v44  ;;  %v424_v48 = vpop.f32.mrb[11].mxu0 }
 0x36f   :  { %v332_v49 = vmul.f32 1.442695, %v331_v47 }
 0x371   :  { %440 = vpow2.f32 %v332_v49 }
 0x37b   :  { %v441_v50 = vpop.eup %440 }
 0x37c   :  { %v334_v51 = vadd.f32 1.0, %v441_v50 }
 0x37e   :  { %442 = vrcp.f32 %v334_v51 }
 0x388   :  { %v443_v52 = vpop.eup %442 }
 0x389   :  { %342 = vperm.xlu0 %429, %v443_v52   ;;  %v339_v53 = vsub.f32 1.0, %v443_v52 }
 0x38d   :  { %347 = vperm.xlu0 %429, %v339_v53  }
 0x408   :  { %v343_v56 = vpop.permute.xlu0 %342 }
 0x40c   :  { %v348_v57 = vpop.permute.xlu0 %347 }
 0x40d   :  { %v350_v58 = vsel %vm338_vm6, %v343_v56, %v348_v57 }
 0x40e   :  { %352 = vst.msk [vmem:[%s575_s9] sm:$0xff] %vm351_vm7, %v350_v58 }

</bundles_post_ra>
